<compile_context>
chip_gen: v5e
topology: v5e:2x2
jax: 0.10.0
libtpu: 0.0.40
codegen_flags: <defaults>
</compile_context>

<pallas_src>
import jax
import jax.numpy as jnp
from jax.experimental import pallas as pl
from jax.experimental.pallas import tpu as pltpu

_LANES = 128


def _scale_add_kernel(w_ref, b_ref, x_ref, o_ref):
    # w_ref, b_ref: (1,) scalars in SMEM.  x_ref, o_ref: (rows, 128) in VMEM.
    w = w_ref[0]
    b = b_ref[0]
    # Multiply-add in f32, cast last (correct rounding if dtype ever narrows).
    o_ref[...] = (x_ref[...] * w + b).astype(o_ref.dtype)


def mylinear_forward(x, weight, bias):
    """Forward of nn.Linear(1, 1): x [N, 1] f32, weight [1, 1], bias [1]."""
    n, in_f = x.shape
    out_f = weight.shape[0]
    assert in_f == 1 and out_f == 1, "kernel is specialized to Linear(1, 1)"
    # TODO(synk): for a generalized Linear (in/out > 1) switch back to a tiled
    # MXU matmul (dot_general contracting on the last dims, tiles sized per-gen).

    # Lane-dense layout: pad N to a multiple of 128 and view as (rows, 128).
    padded = ((n + _LANES - 1) // _LANES) * _LANES
    rows = padded // _LANES
    x_flat = jnp.pad(x.reshape(n), (0, padded - n)).reshape(rows, _LANES)
    w_s = weight.reshape(1)
    b_s = bias.reshape(1)

    out_flat = pl.pallas_call(
        _scale_add_kernel,
        out_shape=jax.ShapeDtypeStruct((rows, _LANES), x.dtype),
        in_specs=[
            pl.BlockSpec(memory_space=pltpu.SMEM),   # weight scalar
            pl.BlockSpec(memory_space=pltpu.SMEM),   # bias scalar
            pl.BlockSpec((rows, _LANES), lambda: (0, 0)),
        ],
        out_specs=pl.BlockSpec((rows, _LANES), lambda: (0, 0)),
    )(w_s, b_s, x_flat)

    # Drop pad rows and restore the [N, out_features] shape.
    return out_flat.reshape(padded)[:n].reshape(n, out_f)


if __name__ == "__main__":
    key = jax.random.PRNGKey(0)
    kx, kw, kb = jax.random.split(key, 3)

    # Module shapes: nn.Linear(1, 1); forward input x is [500, 1].
    N, IN_F, OUT_F = 500, 1, 1
    x = jax.random.uniform(kx, (N, IN_F), dtype=jnp.float32)

    # Deterministic parameter init (mimic PyTorch's U(-1/sqrt(in), 1/sqrt(in))).
    bound = 1.0 / (IN_F ** 0.5)
    weight = jax.random.uniform(
        kw, (OUT_F, IN_F), dtype=jnp.float32, minval=-bound, maxval=bound)
    bias = jax.random.uniform(
        kb, (OUT_F,), dtype=jnp.float32, minval=-bound, maxval=bound)

    out = mylinear_forward(x, weight, bias)
    out = jax.block_until_ready(out)

    # Sanity check against plain-JAX reference (torch.nn.Linear semantics).
    ref = x @ weight.T + bias
    assert out.shape == (N, OUT_F)
    assert jnp.allclose(out, ref, atol=1e-5, rtol=1e-5)

    print("KERNEL_OK")
</pallas_src>

<mosaic_0001>
module attributes {stable_mosaic.version = 11 : i64} {
  func.func @_scale_add_kernel(%arg0: memref<1xf32, #tpu.memory_space<smem>>, %arg1: memref<1xf32, #tpu.memory_space<smem>>, %arg2: memref<4x128xf32, #tpu.memory_space<vmem>>, %arg3: memref<4x128xf32, #tpu.memory_space<vmem>>) attributes {dimension_semantics = [], scalar_prefetch = 0 : i64, scratch_operands = 0 : i64, tpu.core_type = #tpu.core_type<tc>} {
    %c0 = arith.constant 0 : index
    %0 = memref.load %arg0[%c0] : memref<1xf32, #tpu.memory_space<smem>>
    %c0_0 = arith.constant 0 : index
    %1 = memref.load %arg1[%c0_0] : memref<1xf32, #tpu.memory_space<smem>>
    %c0_1 = arith.constant 0 : index
    %c0_2 = arith.constant 0 : index
    %2 = vector.load %arg2[%c0_1, %c0_2] : memref<4x128xf32, #tpu.memory_space<vmem>>, vector<4x128xf32>
    %3 = vector.broadcast %0 : f32 to vector<4x128xf32>
    %4 = arith.mulf %2, %3 : vector<4x128xf32>
    %5 = vector.broadcast %1 : f32 to vector<4x128xf32>
    %6 = arith.addf %4, %5 : vector<4x128xf32>
    %c0_3 = arith.constant 0 : index
    %c0_4 = arith.constant 0 : index
    %7 = vector.load %arg3[%c0_3, %c0_4] : memref<4x128xf32, #tpu.memory_space<vmem>>, vector<4x128xf32>
    tpu.vector_store %arg3[%c0_3, %c0_4], %6 {strides = array<i32>} : memref<4x128xf32, #tpu.memory_space<vmem>>, vector<4x128xf32>,
    return
  }
}

</mosaic_0001>

<bundles_post_ra>
// kernel: tpu_custom_call.1
= control target key start
LH: loop header
LB: loop body
LE: loop exit
PB: predicated region body
PF: predicated region fallthrough
CT: control target
= control target key end

     0   :  { %s101_s0 = inlined_call_operand.<no memory space> [shape: f32[1], index: 0, kind: input, shape index: {}]   ;;  %s102_s1 = inlined_call_operand.<no memory space> [shape: f32[1], index: 1, kind: input, shape index: {}]   ;;  %s103_s2 = inlined_call_operand.vmem [shape: f32[4,128], index: 2, kind: input, shape index: {}]   ;;  %s104_s3 = inlined_call_operand.hbm [shape: f32[4,128], index: 3, kind: output, shape index: {}]  }
   0x1   :  { %v19_v0 = vld [vmem:[%s103_s2] sm:$0xf]  ;;  %v20_v1 = vstv %s101_s0  ;;  %v22_v2 = vstv %s102_s1 }
   0x2   :  { %10 = vsyncpa [#allocation5], 0  ;;  %s32_s20 = sshll.u32 %s104_s3, 4  ;;  %v21_v3 = vmul.f32 %v20_v1, %v19_v0  ;;  %s68_s21 = smov [#allocation4]   ;;  %s33_s20 = int_to_ptr.hbm [resolvable:$true] %s32_s20 }
   0x3   :  { %s30_s22 = sshll.u32 %s68_s21, 4  ;;  %s31_s22 = int_to_ptr.vmem [resolvable:$true] %s30_s22 }
   0x4   :  { %v23_v4 = vadd.f32 %v22_v2, %v21_v3 }
   0x6   :  { %24 = vst [vmem:[#allocation4] sm:$0xf] %v23_v4 }
   0x7   :  { %35 = dma.vmem_to_hbm [thread:$0]  %s31_s22, 64, %s33_s20, [#allocation5]  }
   0x8   :  { %66 = dma.done.wait [#allocation5], 64  }
   0x9   :  { %67 = vsyncadd [#allocation5], 4294967232 }
   0xa   :  { %40 = vsyncpa [#allocation5], 1 }

</bundles_post_ra>
